<compile_context>
chip_gen: v5e
topology: v5e:2x2
jax: 0.10.0
libtpu: 0.0.40
codegen_flags: <defaults>
</compile_context>

<pallas_src>
import functools

import jax
import jax.numpy as jnp
from jax.experimental import pallas as pl
from jax.experimental.pallas import tpu as pltpu


def _round_up(x, m):
    return ((x + m - 1) // m) * m


def _pick_tile(dim_p, cap):
    """Largest multiple of 128 that is <= cap and divides dim_p (dim_p % 128 == 0)."""
    t = min(cap, dim_p)
    t = (t // 128) * 128
    while t > 128 and dim_p % t != 0:
        t -= 128
    return max(t, 128)


def _vmem_budget_bytes():
    """Generation-aware VMEM budget (also used as vmem_limit_bytes)."""
    cap = None
    try:
        info = pltpu.get_tpu_info()
        cap = int(getattr(info, "vmem_capacity_bytes", 0))
    except Exception:
        cap = None
    if not cap or cap <= 0:
        cap = 64 * 1024 * 1024          # conservative default (v7x physical VMEM)
    budget = int(cap * 0.8)             # headroom for compiler-internal scratch
    return max(32 * 1024 * 1024, min(budget, 112 * 1024 * 1024))


def _resident_spec(shape):
    """Whole-array, grid-invariant input: keep resident, single-buffered."""
    if hasattr(pl, "Buffered"):
        try:
            return pl.BlockSpec(shape, lambda i: (0, 0), pipeline_mode=pl.Buffered(1))
        except TypeError:
            pass
    return pl.BlockSpec(shape, lambda i: (0, 0))


# ----------------------------------------------------------------------------
# Fused kernel: whole MLP on one batch tile, weights resident in VMEM.
#   refs = (x_ref, w0_ref, b0_ref, w1_ref, b1_ref, ..., o_ref)
#   x_ref: (TILE_B, D0_pad)   w_i: (Din_pad, Dout_pad)   b_i: (1, Dout_pad)
# ----------------------------------------------------------------------------
def _mlp_kernel(*refs, num_layers, final_relu_layer):
    x_ref = refs[0]
    o_ref = refs[-1]
    wb_refs = refs[1:-1]

    h = x_ref[...]                       # native dtype; no f32 upcast of operands
    for i in range(num_layers):
        w_ref = wb_refs[2 * i]
        b_ref = wb_refs[2 * i + 1]
        if i < final_relu_layer:         # ReLU BEFORE this Linear (torch order)
            h = jnp.maximum(h, 0.0)
        lhs = h if h.dtype == w_ref.dtype else h.astype(w_ref.dtype)
        h = jnp.dot(lhs, w_ref[...], preferred_element_type=jnp.float32)
        h = h + b_ref[...].astype(jnp.float32)
    o_ref[...] = h.astype(o_ref.dtype)


# ----------------------------------------------------------------------------
# Streamed fallback kernel: one layer as a tiled matmul (grid bm x n x k),
# weights streamed from HBM in (tk, tn) chunks, pre-ReLU fused into the LHS.
# ----------------------------------------------------------------------------
def _layer_kernel(x_ref, w_ref, b_ref, o_ref, acc_ref, *, apply_relu):
    k = pl.program_id(2)

    @pl.when(k == 0)
    def _():
        acc_ref[...] = jnp.zeros_like(acc_ref)

    lhs = x_ref[...]
    if apply_relu:
        lhs = jnp.maximum(lhs, 0.0)
    if lhs.dtype != w_ref.dtype:
        lhs = lhs.astype(w_ref.dtype)
    acc_ref[...] += jnp.dot(lhs, w_ref[...], preferred_element_type=jnp.float32)

    @pl.when(k == pl.num_programs(2) - 1)
    def _():
        o_ref[...] = (acc_ref[...] + b_ref[...].astype(jnp.float32)).astype(o_ref.dtype)


# ----------------------------------------------------------------------------
# One-time parameter preparation (hoisted out of the per-forward path):
# transpose to (In, Out), zero-pad feature dims to multiples of 128,
# bias -> (1, Out_pad).
# ----------------------------------------------------------------------------
def prepare_mlp_params(params):
    prepared = []
    dims = []
    for w, b in params:
        d_out, d_in = w.shape
        d_in_p = _round_up(d_in, 128)
        d_out_p = _round_up(d_out, 128)
        wt = jnp.zeros((d_in_p, d_out_p), w.dtype).at[:d_in, :d_out].set(w.T)
        bp = jnp.zeros((1, d_out_p), b.dtype).at[0, :d_out].set(b)
        prepared.append((wt, bp))
        dims.append((d_in, d_out, d_in_p, d_out_p))
    return prepared, dims


def _vmem_estimate_bytes(tile_b, dims, x_itemsize, w_itemsizes):
    d_in0_p = dims[0][2]
    d_out_last_p = dims[-1][3]
    # weights/biases single-buffered (Buffered(1)), own dtype
    w_bytes = sum((dip * dop + dop) * isz
                  for (_, _, dip, dop), isz in zip(dims, w_itemsizes))
    max_d = max(max(dip, dop) for (_, _, dip, dop) in dims)
    act_bytes = 3 * tile_b * max_d * 4                   # f32 intermediates
    io_bytes = 2 * tile_b * (d_in0_p + d_out_last_p) * x_itemsize  # double-buffered x/out
    return io_bytes + w_bytes + act_bytes


# ----------------------------------------------------------------------------
# Streamed fallback: one tiled-matmul pallas_call per layer (intermediates go
# through HBM; used only when resident weights exceed the VMEM budget).
# ----------------------------------------------------------------------------
def _mlp_forward_streamed(x, prepared, dims, final_relu_layer, tile_b, budget):
    B = x.shape[0]
    d_in0, _, d_in0_p, _ = dims[0]
    tm = max(8, min(_round_up(B, 8), _round_up(int(tile_b), 8)))
    b_pad = _round_up(B, tm)

    h = jnp.zeros((b_pad, d_in0_p), x.dtype).at[:B, :d_in0].set(x)
    for i, ((wt, bp), (d_in, d_out, d_in_p, d_out_p)) in enumerate(zip(prepared, dims)):
        tn = _pick_tile(d_out_p, 512)
        tk = _pick_tile(d_in_p, 512)
        grid = (b_pad // tm, d_out_p // tn, d_in_p // tk)
        kernel = functools.partial(_layer_kernel, apply_relu=(i < final_relu_layer))
        h = pl.pallas_call(
            kernel,
            out_shape=jax.ShapeDtypeStruct((b_pad, d_out_p), x.dtype),
            grid=grid,
            in_specs=[
                pl.BlockSpec((tm, tk), lambda bi, j, k: (bi, k)),
                pl.BlockSpec((tk, tn), lambda bi, j, k: (k, j)),
                pl.BlockSpec((1, tn), lambda bi, j, k: (0, j)),
            ],
            out_specs=pl.BlockSpec((tm, tn), lambda bi, j, k: (bi, j)),
            scratch_shapes=[pltpu.VMEM((tm, tn), jnp.float32)],
            compiler_params=pltpu.CompilerParams(
                dimension_semantics=("parallel", "parallel", "arbitrary"),
                vmem_limit_bytes=budget,
            ),
        )(h, wt, bp)

    return h[:B, :dims[-1][1]]


# ----------------------------------------------------------------------------
# Forward pass: single fused pallas_call over batch tiles (default), or the
# streamed per-layer path when the resident-weight footprint doesn't fit.
# ----------------------------------------------------------------------------
def mlp_forward_prepared(x, prepared, dims, final_relu=False, tile_b=512,
                         force_streamed=False):
    num_layers = len(prepared)
    final_relu_layer = num_layers if final_relu else num_layers - 1

    B, D0 = x.shape
    d_in0, _, d_in0_p, _ = dims[0]
    assert D0 == d_in0, "input feature dim mismatch"
    d_out_last, d_out_last_p = dims[-1][1], dims[-1][3]

    x_itemsize = jnp.dtype(x.dtype).itemsize
    w_itemsizes = [jnp.dtype(wt.dtype).itemsize for wt, _ in prepared]

    budget = _vmem_budget_bytes()

    # Batch tile: multiple of 8 sublanes; shrink against the generation-aware
    # VMEM budget (same value handed to the compiler as vmem_limit_bytes).
    b8 = _round_up(B, 8)
    tile_b = max(8, min(_round_up(int(tile_b), 8), b8))
    while tile_b > 8 and _vmem_estimate_bytes(tile_b, dims, x_itemsize, w_itemsizes) > budget:
        tile_b = max(8, (tile_b // 2 // 8) * 8)

    fits = _vmem_estimate_bytes(tile_b, dims, x_itemsize, w_itemsizes) <= budget
    if force_streamed or not fits:
        return _mlp_forward_streamed(x, prepared, dims, final_relu_layer,
                                     tile_b, budget)

    # Guarantee >= 2 grid steps when the padded batch allows it so the
    # "parallel" grid axis can shard across v7x's two TensorCores.
    if b8 >= 16 and _round_up(B, tile_b) // tile_b < 2:
        tile_b = max(8, (b8 // 2 // 8) * 8)

    b_pad = _round_up(B, tile_b)

    # Zero-pad input: padded rows/lanes stay exactly zero through the network.
    x_p = jnp.zeros((b_pad, d_in0_p), x.dtype).at[:B, :D0].set(x)

    grid = (b_pad // tile_b,)

    in_specs = [pl.BlockSpec((tile_b, d_in0_p), lambda i: (i, 0))]
    flat_args = [x_p]
    for wt, bp in prepared:
        in_specs.append(_resident_spec(wt.shape))   # resident, single-buffered
        in_specs.append(_resident_spec(bp.shape))   # resident, single-buffered
        flat_args.append(wt)
        flat_args.append(bp)

    kernel = functools.partial(
        _mlp_kernel, num_layers=num_layers, final_relu_layer=final_relu_layer
    )

    out_p = pl.pallas_call(
        kernel,
        out_shape=jax.ShapeDtypeStruct((b_pad, d_out_last_p), x.dtype),
        grid=grid,
        in_specs=in_specs,
        out_specs=pl.BlockSpec((tile_b, d_out_last_p), lambda i: (i, 0)),
        compiler_params=pltpu.CompilerParams(
            dimension_semantics=("parallel",),
            vmem_limit_bytes=budget,
        ),
    )(*flat_args)

    # Slice back to true batch / true output width.
    return out_p[:B, :d_out_last]


def mlp_forward(x, params, final_relu=False, tile_b=512):
    """Convenience wrapper: prepares params then runs the fused kernel."""
    prepared, dims = prepare_mlp_params(params)
    return mlp_forward_prepared(x, prepared, dims, final_relu=final_relu, tile_b=tile_b)


# ----------------------------------------------------------------------------
# Parameter init (torch.nn.Linear-style shapes: W (out,in), b (out,)) and
# pure-JAX reference matching the PyTorch module exactly.
# ----------------------------------------------------------------------------
def init_mlp_params(layer_sizes, key):
    params = []
    for i in range(len(layer_sizes) - 1):
        d_in, d_out = int(layer_sizes[i]), int(layer_sizes[i + 1])
        key, kw, kb = jax.random.split(key, 3)
        bound = 1.0 / (d_in ** 0.5)
        w = jax.random.uniform(kw, (d_out, d_in), jnp.float32, -bound, bound)
        b = jax.random.uniform(kb, (d_out,), jnp.float32, -bound, bound)
        params.append((w, b))
    return params


def mlp_reference(x, params, final_relu=False):
    num_layers = len(params)
    final_relu_layer = num_layers if final_relu else num_layers - 1
    h = x
    for i, (w, b) in enumerate(params):
        if i < final_relu_layer:
            h = jnp.maximum(h, 0.0)
        h = h @ w.T + b
    return h


if __name__ == "__main__":
    # TODO(synk): grad_rev (RevGrad) only alters backward; forward is identity, so it is omitted.
    layer_sizes = [32, 64, 48, 16]   # layer_sizes[0]=input dim, [-1]=output dim
    batch = 8

    key = jax.random.PRNGKey(0)
    key, kx = jax.random.split(key)
    x = jax.random.normal(kx, (batch, layer_sizes[0]), jnp.float32)
    params = init_mlp_params(layer_sizes, key)

    # Prepare once (transpose + pad), then run the single fused kernel.
    prepared, dims = prepare_mlp_params(params)
    out = mlp_forward_prepared(x, prepared, dims, final_relu=False)
    out = jax.block_until_ready(out)

    ref = mlp_reference(x, params, final_relu=False)
    assert out.shape == (batch, layer_sizes[-1])
    assert jnp.allclose(out, ref, atol=1e-4, rtol=1e-4), "mismatch vs reference (fused)"

    # Non-multiple batch -> exercises padding and the >=2-grid-step split.
    key, kx2 = jax.random.split(key)
    x2 = jax.random.normal(kx2, (20, layer_sizes[0]), jnp.float32)
    out2 = jax.block_until_ready(mlp_forward_prepared(x2, prepared, dims))
    ref2 = mlp_reference(x2, params)
    assert out2.shape == (20, layer_sizes[-1])
    assert jnp.allclose(out2, ref2, atol=1e-4, rtol=1e-4), "mismatch vs reference (padded)"

    # Streamed-weights fallback (forced here; auto-selected when resident
    # weights would exceed the per-generation VMEM budget).
    out3 = jax.block_until_ready(
        mlp_forward_prepared(x, prepared, dims, force_streamed=True))
    assert jnp.allclose(out3, ref, atol=1e-4, rtol=1e-4), "mismatch vs reference (streamed)"

    print("KERNEL_OK")
</pallas_src>

<mosaic_0001>
module attributes {stable_mosaic.version = 11 : i64} {
  func.func @_mlp_kernel(%arg0: i32, %arg1: memref<8x128xf32, #tpu.memory_space<vmem>>, %arg2: memref<128x128xf32, #tpu.memory_space<vmem>>, %arg3: memref<1x128xf32, #tpu.memory_space<vmem>>, %arg4: memref<128x128xf32, #tpu.memory_space<vmem>>, %arg5: memref<1x128xf32, #tpu.memory_space<vmem>>, %arg6: memref<128x128xf32, #tpu.memory_space<vmem>>, %arg7: memref<1x128xf32, #tpu.memory_space<vmem>>, %arg8: memref<8x128xf32, #tpu.memory_space<vmem>>) attributes {dimension_semantics = [#tpu.dimension_semantics<parallel>], iteration_bounds = array<i64: 1>, scalar_prefetch = 0 : i64, scratch_operands = 0 : i64, tpu.core_type = #tpu.core_type<tc>, window_params = [{transform_indices = @transform_0, window_bounds = array<i64: 8, 128>}, {pipeline_mode = #tpu.pipeline_mode<synchronous>, transform_indices = @transform_1, window_bounds = array<i64: 128, 128>}, {pipeline_mode = #tpu.pipeline_mode<synchronous>, transform_indices = @transform_2, window_bounds = array<i64: 1, 128>}, {pipeline_mode = #tpu.pipeline_mode<synchronous>, transform_indices = @transform_3, window_bounds = array<i64: 128, 128>}, {pipeline_mode = #tpu.pipeline_mode<synchronous>, transform_indices = @transform_4, window_bounds = array<i64: 1, 128>}, {pipeline_mode = #tpu.pipeline_mode<synchronous>, transform_indices = @transform_5, window_bounds = array<i64: 128, 128>}, {pipeline_mode = #tpu.pipeline_mode<synchronous>, transform_indices = @transform_6, window_bounds = array<i64: 1, 128>}, {transform_indices = @transform_7, window_bounds = array<i64: 8, 128>}]} {
    %c0 = arith.constant 0 : index
    %c0_0 = arith.constant 0 : index
    %0 = vector.load %arg1[%c0, %c0_0] : memref<8x128xf32, #tpu.memory_space<vmem>>, vector<8x128xf32>
    %cst = arith.constant 0.000000e+00 : f32
    %1 = vector.broadcast %cst : f32 to vector<8x128xf32>
    %2 = arith.maximumf %0, %1 : vector<8x128xf32>
    %c0_1 = arith.constant 0 : index
    %c0_2 = arith.constant 0 : index
    %3 = vector.load %arg2[%c0_1, %c0_2] : memref<128x128xf32, #tpu.memory_space<vmem>>, vector<128x128xf32>
    %cst_3 = arith.constant dense<0.000000e+00> : vector<8x128xf32>
    %4 = tpu.matmul %2, %3, %cst_3 {dimension_numbers = #tpu.dot_dimension_numbers<[1], [0], [0], [1], [0, 0, 1, 1], [], []>} : vector<8x128xf32>, vector<128x128xf32>, vector<8x128xf32> -> vector<8x128xf32>
    %c0_4 = arith.constant 0 : index
    %c0_5 = arith.constant 0 : index
    %5 = vector.load %arg3[%c0_4, %c0_5] : memref<1x128xf32, #tpu.memory_space<vmem>>, vector<1x128xf32>
    %6 = vector.broadcast %5 : vector<1x128xf32> to vector<8x128xf32>
    %7 = arith.addf %4, %6 : vector<8x128xf32>
    %cst_6 = arith.constant 0.000000e+00 : f32
    %8 = vector.broadcast %cst_6 : f32 to vector<8x128xf32>
    %9 = arith.maximumf %7, %8 : vector<8x128xf32>
    %c0_7 = arith.constant 0 : index
    %c0_8 = arith.constant 0 : index
    %10 = vector.load %arg4[%c0_7, %c0_8] : memref<128x128xf32, #tpu.memory_space<vmem>>, vector<128x128xf32>
    %cst_9 = arith.constant dense<0.000000e+00> : vector<8x128xf32>
    %11 = tpu.matmul %9, %10, %cst_9 {dimension_numbers = #tpu.dot_dimension_numbers<[1], [0], [0], [1], [0, 0, 1, 1], [], []>} : vector<8x128xf32>, vector<128x128xf32>, vector<8x128xf32> -> vector<8x128xf32>
    %c0_10 = arith.constant 0 : index
    %c0_11 = arith.constant 0 : index
    %12 = vector.load %arg5[%c0_10, %c0_11] : memref<1x128xf32, #tpu.memory_space<vmem>>, vector<1x128xf32>
    %13 = vector.broadcast %12 : vector<1x128xf32> to vector<8x128xf32>
    %14 = arith.addf %11, %13 : vector<8x128xf32>
    %c0_12 = arith.constant 0 : index
    %c0_13 = arith.constant 0 : index
    %15 = vector.load %arg6[%c0_12, %c0_13] : memref<128x128xf32, #tpu.memory_space<vmem>>, vector<128x128xf32>
    %cst_14 = arith.constant dense<0.000000e+00> : vector<8x128xf32>
    %16 = tpu.matmul %14, %15, %cst_14 {dimension_numbers = #tpu.dot_dimension_numbers<[1], [0], [0], [1], [0, 0, 1, 1], [], []>} : vector<8x128xf32>, vector<128x128xf32>, vector<8x128xf32> -> vector<8x128xf32>
    %c0_15 = arith.constant 0 : index
    %c0_16 = arith.constant 0 : index
    %17 = vector.load %arg7[%c0_15, %c0_16] : memref<1x128xf32, #tpu.memory_space<vmem>>, vector<1x128xf32>
    %18 = vector.broadcast %17 : vector<1x128xf32> to vector<8x128xf32>
    %19 = arith.addf %16, %18 : vector<8x128xf32>
    %c0_17 = arith.constant 0 : index
    %c0_18 = arith.constant 0 : index
    %20 = vector.load %arg8[%c0_17, %c0_18] : memref<8x128xf32, #tpu.memory_space<vmem>>, vector<8x128xf32>
    tpu.vector_store %arg8[%c0_17, %c0_18], %19 {strides = array<i32>} : memref<8x128xf32, #tpu.memory_space<vmem>>, vector<8x128xf32>,
    return
  }
  func.func @transform_0(%arg0: i32) -> (i32, i32) {
    %c0_i32 = arith.constant 0 : i32
    %c0_i32_0 = arith.constant 0 : i32
    return %arg0, %c0_i32 : i32, i32
  }
  func.func @transform_1(%arg0: i32) -> (i32, i32) {
    %c0_i32 = arith.constant 0 : i32
    %c0_i32_0 = arith.constant 0 : i32
    %c0_i32_1 = arith.constant 0 : i32
    return %c0_i32, %c0_i32_0 : i32, i32
  }
  func.func @transform_2(%arg0: i32) -> (i32, i32) {
    %c0_i32 = arith.constant 0 : i32
    %c0_i32_0 = arith.constant 0 : i32
    %c0_i32_1 = arith.constant 0 : i32
    return %c0_i32, %c0_i32_0 : i32, i32
  }
  func.func @transform_3(%arg0: i32) -> (i32, i32) {
    %c0_i32 = arith.constant 0 : i32
    %c0_i32_0 = arith.constant 0 : i32
    %c0_i32_1 = arith.constant 0 : i32
    return %c0_i32, %c0_i32_0 : i32, i32
  }
  func.func @transform_4(%arg0: i32) -> (i32, i32) {
    %c0_i32 = arith.constant 0 : i32
    %c0_i32_0 = arith.constant 0 : i32
    %c0_i32_1 = arith.constant 0 : i32
    return %c0_i32, %c0_i32_0 : i32, i32
  }
  func.func @transform_5(%arg0: i32) -> (i32, i32) {
    %c0_i32 = arith.constant 0 : i32
    %c0_i32_0 = arith.constant 0 : i32
    %c0_i32_1 = arith.constant 0 : i32
    return %c0_i32, %c0_i32_0 : i32, i32
  }
  func.func @transform_6(%arg0: i32) -> (i32, i32) {
    %c0_i32 = arith.constant 0 : i32
    %c0_i32_0 = arith.constant 0 : i32
    %c0_i32_1 = arith.constant 0 : i32
    return %c0_i32, %c0_i32_0 : i32, i32
  }
  func.func @transform_7(%arg0: i32) -> (i32, i32) {
    %c0_i32 = arith.constant 0 : i32
    %c0_i32_0 = arith.constant 0 : i32
    return %arg0, %c0_i32 : i32, i32
  }
}

</mosaic_0001>

<bundles_post_ra>
// kernel: tpu_custom_call.1
= control target key start
LH: loop header
LB: loop body
LE: loop exit
PB: predicated region body
PF: predicated region fallthrough
CT: control target
= control target key end

     0   :  { %12 = vsyncpa [#allocation3], 0  ;;  %s440_s0 = inlined_call_operand.hbm [shape: f32[8,128], index: 0, kind: input, shape index: {}]   ;;  %s441_s1 = inlined_call_operand.hbm [shape: f32[128,128], index: 1, kind: input, shape index: {}]   ;;  %s442_s2 = inlined_call_operand.vmem [shape: f32[1,128], index: 2, kind: input, shape index: {}]   ;;  %s443_s3 = inlined_call_operand.hbm [shape: f32[128,128], index: 3, kind: input, shape index: {}]   ;;  %s444_s4 = inlined_call_operand.vmem [shape: f32[1,128], index: 4, kind: input, shape index: {}]   ;;  %s445_s5 = inlined_call_operand.hbm [shape: f32[128,128], index: 5, kind: input, shape index: {}]   ;;  %s446_s6 = inlined_call_operand.vmem [shape: f32[1,128], index: 6, kind: input, shape index: {}]   ;;  %s447_s7 = inlined_call_operand.hbm [shape: f32[8,128], index: 7, kind: output, shape index: {}]  }
   0x1   :  { %13 = vsyncpa [#allocation6], 0 }
   0x2   :  { %14 = vsyncpa [#allocation9], 0  ;;  %s31_s26 = sshll.u32 %s441_s1, 4  ;;  %s32_s26 = int_to_ptr.hbm [resolvable:$true] %s31_s26 }
   0x3   :  { %15 = vsyncpa [#allocation4], 0  ;;  %s369_s27 = smov [#allocation5]   ;;  %s21_s8 = sshll.u32 %s440_s0, 4  ;;  %s22_s8 = int_to_ptr.hbm [resolvable:$true] %s21_s8 }
   0x4   :  { %s33_s28 = sshll.u32 %s369_s27, 4  ;;  %s370_s9 = smov 128   ;;  %s34_s28 = int_to_ptr.vmem [resolvable:$true] %s33_s28 }
   0x5   :  { %s371_s10 = smov 8   ;;  %s372_s11 = smov [#allocation2]  }
   0x6   :  { %39 = dma.hbm_to_vmem [thread:$0]  %s32_s26, 2048, %s34_s28, [#allocation6], %s370_s9, %s370_s9, %s371_s10  }
   0x7   :  { %s23_s12 = sshll.u32 %s372_s11, 4  ;;  %s46_s15 = sshll.u32 %s443_s3, 4  ;;  %s24_s12 = int_to_ptr.vmem [resolvable:$true] %s23_s12  ;;  %s47_s15 = int_to_ptr.hbm [resolvable:$true] %s46_s15 }
   0x8   :  { %26 = dma.hbm_to_vmem [thread:$0]  %s22_s8, 128, %s24_s12, [#allocation3]  }
   0x9   :  { %s61_s17 = sshll.u32 %s445_s5, 4  ;;  %s373_s18 = smov [#allocation7]   ;;  %s62_s17 = int_to_ptr.hbm [resolvable:$true] %s61_s17 }
   0xa   :  { %s48_s19 = sshll.u32 %s373_s18, 4  ;;  %s374_s0 = smov [#allocation8]   ;;  %s49_s19 = int_to_ptr.vmem [resolvable:$true] %s48_s19 }
   0xb   :  { %54 = dma.hbm_to_vmem [thread:$0]  %s47_s15, 2048, %s49_s19, [#allocation6], %s370_s9, %s370_s9, %s371_s10  }
   0xc   :  { %s63_s20 = sshll.u32 %s374_s0, 4  ;;  %s64_s20 = int_to_ptr.vmem [resolvable:$true] %s63_s20 }
   0xd   :  { %69 = dma.hbm_to_vmem [thread:$0]  %s62_s17, 2048, %s64_s20, [#allocation9], %s370_s9, %s370_s9, %s371_s10  }
   0xe   :  { %361 = dma.done.wait [#allocation3], 128  }
   0xf   :  { %362 = vsyncadd [#allocation3], 4294967168 }
  0x10   :  { %363 = dma.done.wait [#allocation6], 4096  }
  0x11   :  { %364 = vsyncadd [#allocation6], 4294963200 }
  0x12   :  { %365 = dma.done.wait [#allocation9], 2048  }
  0x13   :  { %366 = vsyncadd [#allocation9], 4294965248  ;;  %v105_v0 = vld [vmem:[#allocation5 + $0x78] sm:$0xff]  ;;  %v104_v1 = vld [vmem:[#allocation5 + $0x70] sm:$0xff]  ;;  %s375_s24 = smov [#allocation10]   ;;  %s219_s28 = sshll.u32 %s447_s7, 4  ;;  %s220_s28 = int_to_ptr.hbm [resolvable:$true] %s219_s28 }
  0x14   :  { %110 = vmatpush.msra.mxu0 %v105_v0  ;;  %v103_v2 = vld [vmem:[#allocation5 + $0x68] sm:$0xff]  ;;  %v102_v3 = vld [vmem:[#allocation5 + $0x60] sm:$0xff]  ;;  %v146_v4 = vld [vmem:[#allocation7 + $0x78] sm:$0xff]  ;;  %s217_s25 = sshll.u32 %s375_s24, 4  ;;  %s218_s25 = int_to_ptr.vmem [resolvable:$true] %s217_s25 }
  0x15   :  { %v101_v5 = vld [vmem:[#allocation5 + $0x58] sm:$0xff]  ;;  %151 = vmatpush.msra.mxu1 %v146_v4  ;;  %v145_v6 = vld [vmem:[#allocation7 + $0x70] sm:$0xff]  ;;  %v144_v7 = vld [vmem:[#allocation7 + $0x68] sm:$0xff] }
  0x16   :  { %111 = vmatpush.msra.mxu0 %v104_v1  ;;  %v100_v8 = vld [vmem:[#allocation5 + $0x50] sm:$0xff]  ;;  %v143_v9 = vld [vmem:[#allocation7 + $0x60] sm:$0xff]  ;;  %v99_v10 = vld [vmem:[#allocation5 + $0x48] sm:$0xff] }
  0x17   :  { %152 = vmatpush.msra.mxu1 %v145_v6  ;;  %v142_v11 = vld [vmem:[#allocation7 + $0x58] sm:$0xff]  ;;  %v98_v12 = vld [vmem:[#allocation5 + $0x40] sm:$0xff]  ;;  %v141_v13 = vld [vmem:[#allocation7 + $0x50] sm:$0xff] }
  0x18   :  { %112 = vmatpush.msra.mxu0 %v103_v2  ;;  %v97_v14 = vld [vmem:[#allocation5 + $0x38] sm:$0xff]  ;;  %v140_v15 = vld [vmem:[#allocation7 + $0x48] sm:$0xff]  ;;  %v96_v16 = vld [vmem:[#allocation5 + $0x30] sm:$0xff] }
  0x19   :  { %153 = vmatpush.msra.mxu1 %v144_v7  ;;  %v139_v17 = vld [vmem:[#allocation7 + $0x40] sm:$0xff]  ;;  %v95_v18 = vld [vmem:[#allocation5 + $0x28] sm:$0xff]  ;;  %v138_v19 = vld [vmem:[#allocation7 + $0x38] sm:$0xff] }
  0x1a   :  { %113 = vmatpush.msra.mxu0 %v102_v3  ;;  %v94_v20 = vld [vmem:[#allocation5 + $0x20] sm:$0xff]  ;;  %v137_v21 = vld [vmem:[#allocation7 + $0x30] sm:$0xff]  ;;  %v93_v22 = vld [vmem:[#allocation5 + $0x18] sm:$0xff] }
  0x1b   :  { %154 = vmatpush.msra.mxu1 %v143_v9  ;;  %v136_v23 = vld [vmem:[#allocation7 + $0x28] sm:$0xff]  ;;  %v92_v24 = vld [vmem:[#allocation5 + $0x10] sm:$0xff]  ;;  %v88_v25 = vld [vmem:[#allocation2] sm:$0xff] }
  0x1c   :  { %114 = vmatpush.msra.mxu0 %v101_v5  ;;  %v135_v26 = vld [vmem:[#allocation7 + $0x20] sm:$0xff]  ;;  %v91_v27 = vld [vmem:[#allocation5 + $0x8] sm:$0xff]  ;;  %v134_v28 = vld [vmem:[#allocation7 + $0x18] sm:$0xff]  ;;  %v89_v30 = vmax.f32 %v88_v25, 0.0 }
  0x1d   :  { %155 = vmatpush.msra.mxu1 %v142_v11  ;;  %v90_v29 = vld [vmem:[#allocation5] sm:$0xff]  ;;  %v133_v31 = vld [vmem:[#allocation7 + $0x10] sm:$0xff]  ;;  %v132_v32 = vld [vmem:[#allocation7 + $0x8] sm:$0xff] }
  0x1e   :  { %115 = vmatpush.msra.mxu0 %v100_v8  ;;  %v131_v33 = vld [vmem:[#allocation7] sm:$0xff]  ;;  %v186_v34 = vld [vmem:[#allocation8 + $0x78] sm:$0xff]  ;;  %v185_v35 = vld [vmem:[#allocation8 + $0x70] sm:$0xff] }
  0x1f   :  { %156 = vmatpush.msra.mxu1 %v141_v13  ;;  %191 = vmatpush.msra.mxu2 %v186_v34  ;;  %v184_v36 = vld [vmem:[#allocation8 + $0x68] sm:$0xff]  ;;  %v183_v37 = vld [vmem:[#allocation8 + $0x60] sm:$0xff]  ;;  %v182_v38 = vld [vmem:[#allocation8 + $0x58] sm:$0xff] }
  0x20   :  { %116 = vmatpush.msra.mxu0 %v99_v10  ;;  %v181_v39 = vld [vmem:[#allocation8 + $0x50] sm:$0xff]  ;;  %v180_v40 = vld [vmem:[#allocation8 + $0x48] sm:$0xff]  ;;  %v179_v41 = vld [vmem:[#allocation8 + $0x40] sm:$0xff] }
  0x21   :  { %157 = vmatpush.msra.mxu1 %v140_v15  ;;  %192 = vmatpush.msra.mxu2 %v185_v35  ;;  %v178_v42 = vld [vmem:[#allocation8 + $0x38] sm:$0xff]  ;;  %v177_v43 = vld [vmem:[#allocation8 + $0x30] sm:$0xff]  ;;  %v176_v44 = vld [vmem:[#allocation8 + $0x28] sm:$0xff] }
  0x22   :  { %117 = vmatpush.msra.mxu0 %v98_v12  ;;  %v175_v45 = vld [vmem:[#allocation8 + $0x20] sm:$0xff]  ;;  %v174_v46 = vld [vmem:[#allocation8 + $0x18] sm:$0xff]  ;;  %v173_v48 = vld [vmem:[#allocation8 + $0x10] sm:$0xff] }
  0x23   :  { %158 = vmatpush.msra.mxu1 %v139_v17  ;;  %193 = vmatpush.msra.mxu2 %v184_v36  ;;  %v238_v47 = vld [vmem:[%s442_s2] ss:$0 sm:$0xff]  ;;  %v172_v52 = vld [vmem:[#allocation8 + $0x8] sm:$0xff]  ;;  %v171_v53 = vld [vmem:[#allocation8] sm:$0xff] }
  0x24   :  { %118 = vmatpush.msra.mxu0 %v97_v14  ;;  %v239_v54 = vld [vmem:[%s444_s4] ss:$0 sm:$0xff] }
  0x25   :  { %159 = vmatpush.msra.mxu1 %v138_v19  ;;  %194 = vmatpush.msra.mxu2 %v183_v37  ;;  %v240_v57 = vld [vmem:[%s446_s6] ss:$0 sm:$0xff] }
  0x26   :  { %119 = vmatpush.msra.mxu0 %v96_v16 }
  0x27   :  { %160 = vmatpush.msra.mxu1 %v137_v21  ;;  %195 = vmatpush.msra.mxu2 %v182_v38 }
  0x28   :  { %120 = vmatpush.msra.mxu0 %v95_v18 }
  0x29   :  { %161 = vmatpush.msra.mxu1 %v136_v23  ;;  %196 = vmatpush.msra.mxu2 %v181_v39 }
  0x2a   :  { %121 = vmatpush.msra.mxu0 %v94_v20 }
  0x2b   :  { %162 = vmatpush.msra.mxu1 %v135_v26  ;;  %197 = vmatpush.msra.mxu2 %v180_v40 }
  0x2c   :  { %122 = vmatpush.msra.mxu0 %v93_v22 }
  0x2d   :  { %163 = vmatpush.msra.mxu1 %v134_v28  ;;  %198 = vmatpush.msra.mxu2 %v179_v41 }
  0x2e   :  { %123 = vmatpush.msra.mxu0 %v92_v24 }
  0x2f   :  { %164 = vmatpush.msra.mxu1 %v133_v31  ;;  %199 = vmatpush.msra.mxu2 %v178_v42 }
  0x30   :  { %124 = vmatpush.msra.mxu0 %v91_v27 }
  0x31   :  { %165 = vmatpush.msra.mxu1 %v132_v32  ;;  %200 = vmatpush.msra.mxu2 %v177_v43 }
  0x32   :  { %125 = vmatpush.msra.mxu0 %v90_v29 }
  0x33   :  { %126 = vmatmul.f32.vlgmr.msra.gmra.mxu0 %v89_v30  ;;  %166 = vmatpush.msra.mxu1 %v131_v33 }
  0x34   :  { %201 = vmatpush.msra.mxu2 %v176_v44 }
  0x36   :  { %202 = vmatpush.msra.mxu2 %v175_v45 }
  0x38   :  { %203 = vmatpush.msra.mxu2 %v174_v46 }
  0x3a   :  { %204 = vmatpush.msra.mxu2 %v173_v48 }
  0x3c   :  { %205 = vmatpush.msra.mxu2 %v172_v52 }
  0x3e   :  { %206 = vmatpush.msra.mxu2 %v171_v53 }
  0xb0   :  { %v127_v49 = vpop.f32.mrf.mxu0 }
  0xb1   :  { %v128_v50 = vadd.f32 %v238_v47, %v127_v49 }
  0xb3   :  { %v130_v51 = vmax.f32 %v128_v50, 0.0 }
  0xb5   :  { %167 = vmatmul.f32.vlgmr.msra.gmra.mxu1 %v130_v51 }
 0x132   :  { %v168_v55 = vpop.f32.mrf.mxu1 }
 0x133   :  { %v169_v56 = vadd.f32 %v239_v54, %v168_v55 }
 0x135   :  { %207 = vmatmul.f32.vlgmr.msra.gmra.mxu2 %v169_v56 }
 0x1b8   :  { %v208_v58 = vpop.f32.mrf.mxu2 }
 0x1b9   :  { %v209_v59 = vadd.f32 %v240_v57, %v208_v58 }
 0x1bb   :  { %211 = vst [vmem:[#allocation10] sm:$0xff] %v209_v59 }
 0x1bc   :  { %222 = dma.vmem_to_hbm [thread:$0]  %s218_s25, 128, %s220_s28, [#allocation4]  }
 0x1bd   :  { %367 = dma.done.wait [#allocation4], 128  }
 0x1be   :  { %368 = vsyncadd [#allocation4], 4294967168 }
 0x1bf   :  { %227 = vsyncpa [#allocation3], 1 }
 0x1c0   :  { %228 = vsyncpa [#allocation6], 1 }
 0x1c1   :  { %229 = vsyncpa [#allocation9], 1 }
 0x1c2   :  { %230 = vsyncpa [#allocation4], 1 }

</bundles_post_ra>
